<compile_context>
chip_gen: v7x
topology: tpu7x:2x2x1
jax: 0.10.0
libtpu: 0.0.40
codegen_flags: <defaults>
</compile_context>

<pallas_src>
import functools

import jax
import jax.numpy as jnp
from jax import lax
from jax.experimental import pallas as pl
from jax.experimental.pallas import tpu as pltpu

BN_EPS = 1e-5


def autopad(k, p=None, d=1):
    """Same-shape padding, as in the PyTorch module."""
    if d > 1:
        k = d * (k - 1) + 1
    if p is None:
        p = k // 2
    return p


def _round_up(x, m):
    return (x + m - 1) // m * m


def _vmem_budget_bytes():
    """Generation-aware VMEM budget (leaves headroom below physical capacity)."""
    try:
        cap = int(pltpu.get_tpu_info().vmem_capacity_bytes)
    except Exception:
        cap = 64 * 1024 * 1024                      # conservative (v7x-sized) fallback
    return max(16 << 20, min(int(cap * 3 // 4), 100 << 20))


# --------------------------------------------------------------------------
# Kernels
# --------------------------------------------------------------------------
def _direct_conv_kernel(x_ref, w_ref, b_ref, o_ref, *, shifts, lo):
    """Stride-1 conv + folded BN + SiLU, no im2col.

    x_ref: (C1, L)      bf16 flattened zero-padded input (one image), L mult of 128
    w_ref: (T, C2, C1)  bf16 BN-folded weight, one (C2, C1) slab per tap
    b_ref: (C2, 1)      f32  BN-folded bias
    o_ref: (C2, lo)     lane-dense "wide" output (garbage columns cropped outside)
    """
    xv = x_ref[...]
    c2 = w_ref.shape[1]
    acc = jnp.zeros((c2, lo), jnp.float32)
    for t, sh in enumerate(shifts):                  # static unroll over k*k taps
        xs = xv[:, sh:sh + lo]                       # static in-VMEM shifted window
        acc = acc + jnp.dot(w_ref[t], xs, preferred_element_type=jnp.float32)
    z = acc + b_ref[...]
    silu = z * pl.reciprocal(1.0 + jnp.exp(-z), approx=True)   # exp + recip on EUP
    o_ref[...] = silu.astype(o_ref.dtype)


def _gemm_bn_silu_kernel(p_ref, w_ref, b_ref, o_ref):
    """GEMM on im2col patches + folded BN + SiLU (stride > 1 fallback).

    p_ref: (CK, THW) bf16 patches tile, w_ref: (C2, CK) bf16, b_ref: (C2,1) f32,
    o_ref: (C2, THW) compute-dtype output tile (lane-dense).
    """
    z = jnp.dot(w_ref[...], p_ref[...], preferred_element_type=jnp.float32)
    z = z + b_ref[...]
    silu = z * pl.reciprocal(1.0 + jnp.exp(-z), approx=True)
    o_ref[...] = silu.astype(o_ref.dtype)


# --------------------------------------------------------------------------
# Wrapper helpers (plain JAX glue: BN folding, im2col, tile selection)
# --------------------------------------------------------------------------
def _fold_bn(w, gamma, beta, mean, var):
    """Fold inference BatchNorm into the conv weight; returns (C2,C1,k,k), (C2,1)."""
    s = gamma * lax.rsqrt(var + BN_EPS)                         # (C2,)
    wf = w * s[:, None, None, None]                             # (C2, C1, k, k)
    bias = (beta - mean * s).reshape(-1, 1)                     # (C2, 1)
    return wf, bias


def _im2col(x, k, s, p, d, dtype):
    """Patches (B, C1*k*k, Ho*Wo) in `dtype`; tap-major, channel-minor rows."""
    B, C, H, W = x.shape
    Ho = (H + 2 * p - d * (k - 1) - 1) // s + 1
    Wo = (W + 2 * p - d * (k - 1) - 1) // s + 1
    xp = jnp.pad(x, ((0, 0), (0, 0), (p, p), (p, p))).astype(dtype)
    cols = []
    for dy in range(k):
        for dx in range(k):
            oy, ox = dy * d, dx * d
            cols.append(xp[:, :, oy:oy + (Ho - 1) * s + 1:s,
                               ox:ox + (Wo - 1) * s + 1:s])     # (B, C, Ho, Wo)
    patches = jnp.concatenate(cols, axis=1).reshape(B, C * k * k, Ho * Wo)
    return patches, Ho, Wo


def _pick_spatial_tile(hw128, ck, c2, in_b, out_b, budget):
    """Largest multiple-of-128 tile fitting double-buffered in/out in budget."""
    fixed = 2 * c2 * ck * in_b + (1 << 16)          # weight (double-buffered) + bias
    per_lane = 2 * (ck * in_b + c2 * out_b)         # double-buffered patch + out
    t = (int(budget * 0.8) - fixed) // per_lane
    t = (max(t, 128) // 128) * 128
    return int(max(128, min(t, 8192, hw128)))


# --------------------------------------------------------------------------
# Forward paths
# --------------------------------------------------------------------------
def _forward_direct(x, wf, bias, *, k, p, d, compute_dtype, out_dtype, budget):
    """Stride-1 path: fused conv (tap accumulation in-kernel), no patch tensor."""
    B, C1, H, W = x.shape
    C2 = wf.shape[0]
    Hp, Wp = H + 2 * p, W + 2 * p
    Ho, Wo = Hp - d * (k - 1), Wp - d * (k - 1)
    lo = _round_up(Ho * Wp, 128)                    # lane-dense "wide" output width
    shifts = tuple(dy * d * Wp + dx * d for dy in range(k) for dx in range(k))
    L = _round_up(max(shifts) + lo, 128)            # >= Hp*Wp by construction

    in_b = jnp.dtype(compute_dtype).itemsize
    out_b = jnp.dtype(out_dtype).itemsize
    need = (2 * C1 * L * in_b + 2 * C2 * lo * out_b + 2 * k * k * C2 * C1 * in_b
            + C2 * lo * 4 + 2 * C1 * lo * in_b + (1 << 20))
    if need > budget:
        return None                                 # too big: use tiled im2col path

    xp = jnp.pad(x, ((0, 0), (0, 0), (p, p), (p, p))).astype(compute_dtype)
    xf = xp.reshape(B, C1, Hp * Wp)
    xf = jnp.pad(xf, ((0, 0), (0, 0), (0, L - Hp * Wp)))
    w_taps = jnp.transpose(wf, (2, 3, 0, 1)).reshape(k * k, C2, C1).astype(compute_dtype)

    kern = functools.partial(_direct_conv_kernel, shifts=shifts, lo=lo)
    # TODO(synk): with B == 1 this grid gives a single work unit (one v7x core).
    out_wide = pl.pallas_call(
        kern,
        grid=(B,),
        in_specs=[pl.BlockSpec((None, C1, L), lambda b: (b, 0, 0)),
                  pl.BlockSpec((k * k, C2, C1), lambda b: (0, 0, 0)),
                  pl.BlockSpec((C2, 1), lambda b: (0, 0))],
        out_specs=pl.BlockSpec((None, C2, lo), lambda b: (b, 0, 0)),
        out_shape=jax.ShapeDtypeStruct((B, C2, lo), out_dtype),
        compiler_params=pltpu.CompilerParams(
            dimension_semantics=("parallel",),
            vmem_limit_bytes=int(budget)),
    )(xf, w_taps, bias)

    out = out_wide[:, :, :Ho * Wp].reshape(B, C2, Ho, Wp)[:, :, :, :Wo]
    return out


def _forward_im2col(x, wf, bias, *, k, s, p, d, compute_dtype, out_dtype, budget):
    """General path (stride > 1 / oversized maps): im2col + tiled fused GEMM."""
    B, C1, H, W = x.shape
    C2 = wf.shape[0]
    # tap-major ordering matches _im2col: index = (dy*k + dx)*C1 + c1
    wm = jnp.transpose(wf, (0, 2, 3, 1)).reshape(C2, -1).astype(compute_dtype)
    patches, Ho, Wo = _im2col(x, k, s, p, d, compute_dtype)     # (B, CK, HW)
    CK = wm.shape[1]
    HW = Ho * Wo

    in_b = jnp.dtype(compute_dtype).itemsize
    out_b = jnp.dtype(out_dtype).itemsize
    hw128 = _round_up(HW, 128)
    thw = _pick_spatial_tile(hw128, CK, C2, in_b, out_b, budget)
    hw_pad = _round_up(HW, thw)
    if hw_pad > HW:
        patches = jnp.pad(patches, ((0, 0), (0, 0), (0, hw_pad - HW)))
    n_tiles = hw_pad // thw

    out = pl.pallas_call(
        _gemm_bn_silu_kernel,
        grid=(B * n_tiles,),                        # flattened -> megacore balanced
        in_specs=[pl.BlockSpec((None, CK, thw),
                               lambda g: (g // n_tiles, 0, g % n_tiles)),
                  pl.BlockSpec((C2, CK), lambda g: (0, 0)),
                  pl.BlockSpec((C2, 1), lambda g: (0, 0))],
        out_specs=pl.BlockSpec((None, C2, thw),
                               lambda g: (g // n_tiles, 0, g % n_tiles)),
        out_shape=jax.ShapeDtypeStruct((B, C2, hw_pad), out_dtype),
        compiler_params=pltpu.CompilerParams(
            dimension_semantics=("parallel",),
            vmem_limit_bytes=int(budget)),
    )(patches, wm, bias)

    return out[:, :, :HW].reshape(B, C2, Ho, Wo)


def conv_forward(x, params, *, k=1, s=1, p=None, g=1, d=1,
                 compute_dtype=jnp.bfloat16, out_dtype=jnp.bfloat16):
    """Conv2d(bias=False) -> BatchNorm2d (running stats) -> SiLU, fused on TPU.

    Note: activations/weights are cast to bf16 for the MXU and the output is
    written in bf16 (f32 accumulate / bias / SiLU inside the kernel).
    """
    if g != 1:
        raise NotImplementedError("grouped conv (g > 1) not implemented")
    pad = autopad(k, p, d)
    wf, bias = _fold_bn(params['w'], params['gamma'], params['beta'],
                        params['mean'], params['var'])
    budget = _vmem_budget_bytes()

    if s == 1:
        out = _forward_direct(x, wf, bias, k=k, p=pad, d=d,
                              compute_dtype=compute_dtype, out_dtype=out_dtype,
                              budget=budget)
        if out is not None:
            return out
    return _forward_im2col(x, wf, bias, k=k, s=s, p=pad, d=d,
                           compute_dtype=compute_dtype, out_dtype=out_dtype,
                           budget=budget)


# --------------------------------------------------------------------------
# Deterministic parameter init (Conv2d weight, bias=False; BN running stats)
# --------------------------------------------------------------------------
def init_params(key, c1, c2, k):
    kw, kg, kb, km, kv = jax.random.split(key, 5)
    w = jax.random.normal(kw, (c2, c1, k, k), jnp.float32) * (2.0 / (c1 * k * k)) ** 0.5
    return dict(
        w=w,
        gamma=jax.random.uniform(kg, (c2,), jnp.float32, 0.8, 1.2),
        beta=0.1 * jax.random.normal(kb, (c2,), jnp.float32),
        mean=0.1 * jax.random.normal(km, (c2,), jnp.float32),
        var=jax.random.uniform(kv, (c2,), jnp.float32, 0.5, 1.5),
    )


# --------------------------------------------------------------------------
# Pure-JAX reference (f32, HIGHEST precision) for validation
# --------------------------------------------------------------------------
def reference_forward(x, params, *, k=1, s=1, p=None, g=1, d=1):
    pad = autopad(k, p, d)
    z = lax.conv_general_dilated(
        x, params['w'], window_strides=(s, s), padding=[(pad, pad), (pad, pad)],
        rhs_dilation=(d, d), feature_group_count=g,
        dimension_numbers=('NCHW', 'OIHW', 'NCHW'),
        precision=lax.Precision.HIGHEST)
    rs = lambda a: a.reshape(1, -1, 1, 1)
    z = (z - rs(params['mean'])) * (rs(params['gamma']) *
         lax.rsqrt(rs(params['var']) + BN_EPS)) + rs(params['beta'])
    return z * jax.nn.sigmoid(z)


if __name__ == "__main__":
    key = jax.random.PRNGKey(0)
    cases = [
        dict(B=2, c1=16, c2=32, H=16, W=16, k=3, s=1, d=1),   # Conv(c1, c2, 3)
        dict(B=2, c1=16, c2=16, H=16, W=16, k=1, s=1, d=1),   # default Conv(c1, c2)
        dict(B=2, c1=16, c2=32, H=16, W=16, k=3, s=2, d=1),   # strided Conv(c1, c2, 3, 2)
        dict(B=2, c1=16, c2=32, H=16, W=16, k=3, s=1, d=2),   # dilated Conv(c1, c2, 3, 1, d=2)
    ]
    for i, cfg in enumerate(cases):
        kx, kp, key = jax.random.split(key, 3)
        x = jax.random.normal(kx, (cfg['B'], cfg['c1'], cfg['H'], cfg['W']),
                              jnp.float32)
        params = init_params(kp, cfg['c1'], cfg['c2'], cfg['k'])

        fwd = jax.jit(functools.partial(conv_forward,
                                        k=cfg['k'], s=cfg['s'], d=cfg['d']))
        out = jax.block_until_ready(fwd(x, params))
        ref = reference_forward(x, params, k=cfg['k'], s=cfg['s'], d=cfg['d'])

        assert out.shape == ref.shape
        out_f32 = out.astype(jnp.float32)
        # bf16 matmul operands + bf16 output, f32 accumulation -> bf16-level error.
        if not jnp.allclose(out_f32, ref, rtol=5e-2, atol=1e-1):
            max_err = float(jnp.max(jnp.abs(out_f32 - ref)))
            raise AssertionError(
                f"case {i} ({cfg}): Pallas output mismatch, max |err| = {max_err}")

    print("KERNEL_OK")
</pallas_src>

<mosaic_0001>
module attributes {stable_mosaic.version = 11 : i64} {
  func.func @_direct_conv_kernel(%arg0: i32, %arg1: memref<1x16x512xbf16, #tpu.memory_space<vmem>>, %arg2: memref<9x32x16xbf16, #tpu.memory_space<vmem>>, %arg3: memref<32x1xf32, #tpu.memory_space<vmem>>, %arg4: memref<1x32x384xbf16, #tpu.memory_space<vmem>>) attributes {dimension_semantics = [#tpu.dimension_semantics<parallel>], iteration_bounds = array<i64: 2>, scalar_prefetch = 0 : i64, scratch_operands = 0 : i64, tpu.core_type = #tpu.core_type<tc>, window_params = [{transform_indices = @transform_0, window_bounds = array<i64: 1, 16, 512>}, {pipeline_mode = #tpu.pipeline_mode<synchronous>, transform_indices = @transform_1, window_bounds = array<i64: 9, 32, 16>}, {pipeline_mode = #tpu.pipeline_mode<synchronous>, transform_indices = @transform_2, window_bounds = array<i64: 32, 1>}, {transform_indices = @transform_3, window_bounds = array<i64: 1, 32, 384>}]} {
    %c0 = arith.constant 0 : index
    %c0_0 = arith.constant 0 : index
    %c0_1 = arith.constant 0 : index
    %0 = vector.load %arg1[%c0, %c0_0, %c0_1] : memref<1x16x512xbf16, #tpu.memory_space<vmem>>, vector<1x16x512xbf16>
    %1 = vector.shape_cast %0 : vector<1x16x512xbf16> to vector<16x512xbf16>
    %cst = arith.constant 0.000000e+00 : f32
    %2 = vector.broadcast %cst : f32 to vector<32x384xf32>
    %3 = vector.extract_strided_slice %1 {offsets = [0, 0], sizes = [16, 384], strides = [1, 1]} : vector<16x512xbf16> to vector<16x384xbf16>
    %c0_2 = arith.constant 0 : index
    %c0_3 = arith.constant 0 : index
    %c0_4 = arith.constant 0 : index
    %4 = vector.load %arg2[%c0_2, %c0_3, %c0_4] : memref<9x32x16xbf16, #tpu.memory_space<vmem>>, vector<1x32x16xbf16>
    %5 = vector.shape_cast %4 : vector<1x32x16xbf16> to vector<32x16xbf16>
    %cst_5 = arith.constant dense<0.000000e+00> : vector<32x384xf32>
    %6 = tpu.matmul %5, %3, %cst_5 {dimension_numbers = #tpu.dot_dimension_numbers<[1], [0], [0], [1], [0, 0, 1, 1], [], []>} : vector<32x16xbf16>, vector<16x384xbf16>, vector<32x384xf32> -> vector<32x384xf32>
    %7 = arith.addf %2, %6 : vector<32x384xf32>
    %8 = vector.extract_strided_slice %1 {offsets = [0, 1], sizes = [16, 384], strides = [1, 1]} : vector<16x512xbf16> to vector<16x384xbf16>
    %c1 = arith.constant 1 : index
    %c0_6 = arith.constant 0 : index
    %c0_7 = arith.constant 0 : index
    %9 = vector.load %arg2[%c1, %c0_6, %c0_7] : memref<9x32x16xbf16, #tpu.memory_space<vmem>>, vector<1x32x16xbf16>
    %10 = vector.shape_cast %9 : vector<1x32x16xbf16> to vector<32x16xbf16>
    %cst_8 = arith.constant dense<0.000000e+00> : vector<32x384xf32>
    %11 = tpu.matmul %10, %8, %cst_8 {dimension_numbers = #tpu.dot_dimension_numbers<[1], [0], [0], [1], [0, 0, 1, 1], [], []>} : vector<32x16xbf16>, vector<16x384xbf16>, vector<32x384xf32> -> vector<32x384xf32>
    %12 = arith.addf %7, %11 : vector<32x384xf32>
    %13 = vector.extract_strided_slice %1 {offsets = [0, 2], sizes = [16, 384], strides = [1, 1]} : vector<16x512xbf16> to vector<16x384xbf16>
    %c2 = arith.constant 2 : index
    %c0_9 = arith.constant 0 : index
    %c0_10 = arith.constant 0 : index
    %14 = vector.load %arg2[%c2, %c0_9, %c0_10] : memref<9x32x16xbf16, #tpu.memory_space<vmem>>, vector<1x32x16xbf16>
    %15 = vector.shape_cast %14 : vector<1x32x16xbf16> to vector<32x16xbf16>
    %cst_11 = arith.constant dense<0.000000e+00> : vector<32x384xf32>
    %16 = tpu.matmul %15, %13, %cst_11 {dimension_numbers = #tpu.dot_dimension_numbers<[1], [0], [0], [1], [0, 0, 1, 1], [], []>} : vector<32x16xbf16>, vector<16x384xbf16>, vector<32x384xf32> -> vector<32x384xf32>
    %17 = arith.addf %12, %16 : vector<32x384xf32>
    %18 = vector.extract_strided_slice %1 {offsets = [0, 18], sizes = [16, 384], strides = [1, 1]} : vector<16x512xbf16> to vector<16x384xbf16>
    %c3 = arith.constant 3 : index
    %c0_12 = arith.constant 0 : index
    %c0_13 = arith.constant 0 : index
    %19 = vector.load %arg2[%c3, %c0_12, %c0_13] : memref<9x32x16xbf16, #tpu.memory_space<vmem>>, vector<1x32x16xbf16>
    %20 = vector.shape_cast %19 : vector<1x32x16xbf16> to vector<32x16xbf16>
    %cst_14 = arith.constant dense<0.000000e+00> : vector<32x384xf32>
    %21 = tpu.matmul %20, %18, %cst_14 {dimension_numbers = #tpu.dot_dimension_numbers<[1], [0], [0], [1], [0, 0, 1, 1], [], []>} : vector<32x16xbf16>, vector<16x384xbf16>, vector<32x384xf32> -> vector<32x384xf32>
    %22 = arith.addf %17, %21 : vector<32x384xf32>
    %23 = vector.extract_strided_slice %1 {offsets = [0, 19], sizes = [16, 384], strides = [1, 1]} : vector<16x512xbf16> to vector<16x384xbf16>
    %c4 = arith.constant 4 : index
    %c0_15 = arith.constant 0 : index
    %c0_16 = arith.constant 0 : index
    %24 = vector.load %arg2[%c4, %c0_15, %c0_16] : memref<9x32x16xbf16, #tpu.memory_space<vmem>>, vector<1x32x16xbf16>
    %25 = vector.shape_cast %24 : vector<1x32x16xbf16> to vector<32x16xbf16>
    %cst_17 = arith.constant dense<0.000000e+00> : vector<32x384xf32>
    %26 = tpu.matmul %25, %23, %cst_17 {dimension_numbers = #tpu.dot_dimension_numbers<[1], [0], [0], [1], [0, 0, 1, 1], [], []>} : vector<32x16xbf16>, vector<16x384xbf16>, vector<32x384xf32> -> vector<32x384xf32>
    %27 = arith.addf %22, %26 : vector<32x384xf32>
    %28 = vector.extract_strided_slice %1 {offsets = [0, 20], sizes = [16, 384], strides = [1, 1]} : vector<16x512xbf16> to vector<16x384xbf16>
    %c5 = arith.constant 5 : index
    %c0_18 = arith.constant 0 : index
    %c0_19 = arith.constant 0 : index
    %29 = vector.load %arg2[%c5, %c0_18, %c0_19] : memref<9x32x16xbf16, #tpu.memory_space<vmem>>, vector<1x32x16xbf16>
    %30 = vector.shape_cast %29 : vector<1x32x16xbf16> to vector<32x16xbf16>
    %cst_20 = arith.constant dense<0.000000e+00> : vector<32x384xf32>
    %31 = tpu.matmul %30, %28, %cst_20 {dimension_numbers = #tpu.dot_dimension_numbers<[1], [0], [0], [1], [0, 0, 1, 1], [], []>} : vector<32x16xbf16>, vector<16x384xbf16>, vector<32x384xf32> -> vector<32x384xf32>
    %32 = arith.addf %27, %31 : vector<32x384xf32>
    %33 = vector.extract_strided_slice %1 {offsets = [0, 36], sizes = [16, 384], strides = [1, 1]} : vector<16x512xbf16> to vector<16x384xbf16>
    %c6 = arith.constant 6 : index
    %c0_21 = arith.constant 0 : index
    %c0_22 = arith.constant 0 : index
    %34 = vector.load %arg2[%c6, %c0_21, %c0_22] : memref<9x32x16xbf16, #tpu.memory_space<vmem>>, vector<1x32x16xbf16>
    %35 = vector.shape_cast %34 : vector<1x32x16xbf16> to vector<32x16xbf16>
    %cst_23 = arith.constant dense<0.000000e+00> : vector<32x384xf32>
    %36 = tpu.matmul %35, %33, %cst_23 {dimension_numbers = #tpu.dot_dimension_numbers<[1], [0], [0], [1], [0, 0, 1, 1], [], []>} : vector<32x16xbf16>, vector<16x384xbf16>, vector<32x384xf32> -> vector<32x384xf32>
    %37 = arith.addf %32, %36 : vector<32x384xf32>
    %38 = vector.extract_strided_slice %1 {offsets = [0, 37], sizes = [16, 384], strides = [1, 1]} : vector<16x512xbf16> to vector<16x384xbf16>
    %c7 = arith.constant 7 : index
    %c0_24 = arith.constant 0 : index
    %c0_25 = arith.constant 0 : index
    %39 = vector.load %arg2[%c7, %c0_24, %c0_25] : memref<9x32x16xbf16, #tpu.memory_space<vmem>>, vector<1x32x16xbf16>
    %40 = vector.shape_cast %39 : vector<1x32x16xbf16> to vector<32x16xbf16>
    %cst_26 = arith.constant dense<0.000000e+00> : vector<32x384xf32>
    %41 = tpu.matmul %40, %38, %cst_26 {dimension_numbers = #tpu.dot_dimension_numbers<[1], [0], [0], [1], [0, 0, 1, 1], [], []>} : vector<32x16xbf16>, vector<16x384xbf16>, vector<32x384xf32> -> vector<32x384xf32>
    %42 = arith.addf %37, %41 : vector<32x384xf32>
    %43 = vector.extract_strided_slice %1 {offsets = [0, 38], sizes = [16, 384], strides = [1, 1]} : vector<16x512xbf16> to vector<16x384xbf16>
    %c8 = arith.constant 8 : index
    %c0_27 = arith.constant 0 : index
    %c0_28 = arith.constant 0 : index
    %44 = vector.load %arg2[%c8, %c0_27, %c0_28] : memref<9x32x16xbf16, #tpu.memory_space<vmem>>, vector<1x32x16xbf16>
    %45 = vector.shape_cast %44 : vector<1x32x16xbf16> to vector<32x16xbf16>
    %cst_29 = arith.constant dense<0.000000e+00> : vector<32x384xf32>
    %46 = tpu.matmul %45, %43, %cst_29 {dimension_numbers = #tpu.dot_dimension_numbers<[1], [0], [0], [1], [0, 0, 1, 1], [], []>} : vector<32x16xbf16>, vector<16x384xbf16>, vector<32x384xf32> -> vector<32x384xf32>
    %47 = arith.addf %42, %46 : vector<32x384xf32>
    %c0_30 = arith.constant 0 : index
    %c0_31 = arith.constant 0 : index
    %48 = vector.load %arg3[%c0_30, %c0_31] : memref<32x1xf32, #tpu.memory_space<vmem>>, vector<32x1xf32>
    %49 = vector.broadcast %48 : vector<32x1xf32> to vector<32x384xf32>
    %50 = arith.addf %47, %49 : vector<32x384xf32>
    %cst_32 = arith.constant 0.000000e+00 : f32
    %51 = vector.broadcast %cst_32 : f32 to vector<32x384xf32>
    %52 = arith.subf %51, %50 : vector<32x384xf32>
    %53 = math.exp %52 : vector<32x384xf32>
    %cst_33 = arith.constant 1.000000e+00 : f32
    %54 = vector.broadcast %cst_33 : f32 to vector<32x384xf32>
    %55 = arith.addf %54, %53 : vector<32x384xf32>
    %56 = tpu.reciprocal %55 {approx = true} : vector<32x384xf32> -> vector<32x384xf32>
    %57 = arith.mulf %50, %56 : vector<32x384xf32>
    %58 = arith.truncf %57 : vector<32x384xf32> to vector<32x384xbf16>
    %c0_34 = arith.constant 0 : index
    %c0_35 = arith.constant 0 : index
    %c0_36 = arith.constant 0 : index
    %59 = vector.load %arg4[%c0_34, %c0_35, %c0_36] : memref<1x32x384xbf16, #tpu.memory_space<vmem>>, vector<1x32x384xbf16>
    %60 = vector.shape_cast %59 : vector<1x32x384xbf16> to vector<32x384xbf16>
    %61 = vector.shape_cast %58 : vector<32x384xbf16> to vector<1x32x384xbf16>
    tpu.vector_store %arg4[%c0_34, %c0_35, %c0_36], %61 {strides = array<i32>} : memref<1x32x384xbf16, #tpu.memory_space<vmem>>, vector<1x32x384xbf16>,
    return
  }
  func.func @transform_0(%arg0: i32) -> (i32, i32, i32) {
    %c0_i32 = arith.constant 0 : i32
    %c0_i32_0 = arith.constant 0 : i32
    %c0_i32_1 = arith.constant 0 : i32
    return %arg0, %c0_i32, %c0_i32_0 : i32, i32, i32
  }
  func.func @transform_1(%arg0: i32) -> (i32, i32, i32) {
    %c0_i32 = arith.constant 0 : i32
    %c0_i32_0 = arith.constant 0 : i32
    %c0_i32_1 = arith.constant 0 : i32
    %c0_i32_2 = arith.constant 0 : i32
    return %c0_i32, %c0_i32_0, %c0_i32_1 : i32, i32, i32
  }
  func.func @transform_2(%arg0: i32) -> (i32, i32) {
    %c0_i32 = arith.constant 0 : i32
    %c0_i32_0 = arith.constant 0 : i32
    %c0_i32_1 = arith.constant 0 : i32
    return %c0_i32, %c0_i32_0 : i32, i32
  }
  func.func @transform_3(%arg0: i32) -> (i32, i32, i32) {
    %c0_i32 = arith.constant 0 : i32
    %c0_i32_0 = arith.constant 0 : i32
    %c0_i32_1 = arith.constant 0 : i32
    return %arg0, %c0_i32, %c0_i32_0 : i32, i32, i32
  }
}

</mosaic_0001>

<bundles_post_ra>
// kernel: conv_forward.1
= control target key start
LH: loop header
LB: loop body
LE: loop exit
PB: predicated region body
PF: predicated region fallthrough
CT: control target
= control target key end

     0   :  { %s2140_s12 = smov 0   ;;  %s2418_s0 = inlined_call_operand.vmem [shape: bf16[2,16,512], index: 0, kind: input, shape index: {}]   ;;  %s2419_s1 = inlined_call_operand.vmem [shape: bf16[9,32,16], index: 1, kind: input, shape index: {}]   ;;  %s2420_s2 = inlined_call_operand.vmem [shape: f32[32,1], index: 2, kind: input, shape index: {}]   ;;  %s2421_s3 = inlined_call_operand.vmem [shape: bf16[2,32,384], index: 3, kind: output, shape index: {}]  }
   0x1 LB: > { %s1717_s13 = sadd.s32 4294967295, %s2109_s12   ;;  %p1721_p0 = scmp.ge.s32.totalorder %s2109_s12, 1  ;;  %s2109_s12 = sphi %s2140_s12, %s13_s12  }
   0x2   : > { %p137_p1 = scmp.lt.s32.totalorder %s2109_s12, 3 }
   0x4   : > { %p138_p2 = pnand %p1721_p0, %p137_p1 }
   0x5   : > { %p161_p3 = scmp.lt.s32.totalorder (!%p138_p2), %s1717_s13, 1  ;;  %v2111_v0 = vmov (!%p138_p2), 0   ;;  %s2112_s18 = smov (!%p138_p2), 127   ;;  %vm219_vm0 = vcmask (!%p138_p2), 1039360   ;;  %v2037_v11 = vld [vmem:[%s2419_s1 + $0x10] sm:$0xff] (!%p138_p2)   ;;  %vm479_vm1 = vcmask (!%p138_p2), 1031168  }
   0x6   : > { %141 = sbr.rel (%p138_p2) target bundleno = 519 (0x207), region = 32  ;;  %265 = vmatprep.mubr.bf16.mxu1 (!%p138_p2), %v2111_v0  ;;  %524 = vmatprep.mubr.bf16.mxu0 (!%p138_p2), %v2111_v0  ;;  %s2113_s19 = smov (!%p138_p2), 126   ;;  %v1506_v12 = vld [vmem:[%s2420_s2] sm:$0xff] (!%p138_p2)  ;;  %v1507_v13 = vld [vmem:[%s2420_s2 + $0x8] sm:$0xff] (!%p138_p2)  ;;  %vm226_vm2 = vcmask (!%p138_p2), 130048   ;;  %v1508_v18 = vld [vmem:[%s2420_s2 + $0x10] sm:$0xff] (!%p138_p2) }
   0x7   : > { %2029 = vset.pattern.permute.xlu0 (!%p138_p2), %v2111_v0  ;;  %2030 = vset.pattern.permute.xlu1 (!%p138_p2), %v2111_v0  ;;  %s2114_s20 = smov (!%p138_p2), 110   ;;  %s2115_s21 = smov (!%p138_p2), 109   ;;  %v1509_v19 = vld [vmem:[%s2420_s2 + $0x18] sm:$0xff] (!%p138_p2)  ;;  %v2211_v23 = vld [vmem:[%s2419_s1 + $0x20] sm:$0xff] (!%p138_p2)   ;;  %vm629_vm3 = vcmask (!%p138_p2), 900096   ;;  %vm779_vm4 = vcmask (!%p138_p2), 891904  }
   0x8   : > { %s2116_s22 = smov (!%p138_p2), 108   ;;  %s2117_s23 = smov (!%p138_p2), 92   ;;  %v2039_v24 = vld [vmem:[%s2419_s1 + $0x18] sm:$0xff] (!%p138_p2)   ;;  %v2040_v31 = vld [vmem:[%s2419_s1 + $0x28] sm:$0xff] (!%p138_p2)   ;;  %v2041_v36 = vld [vmem:[%s2419_s1 + $0x30] sm:$0xff] (!%p138_p2)   ;;  %vm929_vm5 = vcmask (!%p138_p2), 883712  }
   0x9   : > { %s2118_s24 = smov (!%p138_p2), 91   ;;  %s2119_s25 = smov (!%p138_p2), 90   ;;  %v2042_v37 = vld [vmem:[%s2419_s1] sm:$0xff] (!%p138_p2)   ;;  %v2043_v43 = vld [vmem:[%s2419_s1 + $0x38] sm:$0xff] (!%p138_p2)   ;;  %v2044_v44 = vld [vmem:[%s2419_s1 + $0x8] sm:$0xff] (!%p138_p2)   ;;  %vm1079_vm6 = vcmask (!%p138_p2), 752640  }
   0xa   : > { %v2045_v46 = vld [vmem:[%s2419_s1 + $0x40] sm:$0xff] (!%p138_p2)   ;;  %v2046_v53 = vld [vmem:[%s2419_s1 + $0x48] sm:$0xff] (!%p138_p2)   ;;  %v2047_v56 = vld [vmem:[%s2419_s1 + $0x50] sm:$0xff] (!%p138_p2)   ;;  %vm1229_vm7 = vcmask (!%p138_p2), 744448   ;;  %vm1379_vm8 = vcmask (!%p138_p2), 736256  }
   0xb   : > { %v2048_v62 = vld [vmem:[%s2419_s1 + $0x58] sm:$0xff] (!%p138_p2)  }
   0xd   : > { %s2423_s13 = smov (!%p161_p3, %s1717_s13), 1 }
   0xe   : > { %s1825_s14 = sshll.u32 %s2423_s13, 5 }
   0xf   : > { %s165_s17 = scalar_lea.vmem %s2418_s0, %s1825_s14 }
  0x10   : > { %v2158_v1 = vld [vmem:[%s165_s17 + $0x4] ss:$16 sps:$4 sm:$0xff]   ;;  %v2160_v2 = vld [vmem:[%s165_s17] ss:$16 sps:$4 sm:$0xff]   ;;  %v2162_v3 = vld [vmem:[%s165_s17 + $0x8] ss:$16 sps:$4 sm:$0xff]  }
  0x11   : > { %v2036_v4 = vld [vmem:[%s165_s17 + $0xc] ss:$16 sps:$4 sm:$0xff]   ;;  %213 = vrot.lane.b32.xlu0 %v2158_v1, %s2112_s18  ;;  %211 = vrot.lane.b32.xlu1 %v2160_v2, %s2112_s18 }
  0x15   : > { %215 = vrot.lane.b32.xlu0 %v2162_v3, %s2112_s18  ;;  %217 = vrot.lane.b32.xlu1 %v2036_v4, %s2112_s18 }
  0x19   : > { %473 = vrot.lane.b32.xlu0 %v2158_v1, %s2113_s19  ;;  %475 = vrot.lane.b32.xlu1 %v2162_v3, %s2113_s19 }
  0x1d   : > { %471 = vrot.lane.b32.xlu0 %v2160_v2, %s2113_s19  ;;  %623 = vrot.lane.b32.xlu1 %v2158_v1, %s2114_s20 }
  0x21   : > { %625 = vrot.lane.b32.xlu0 %v2162_v3, %s2114_s20  ;;  %621 = vrot.lane.b32.xlu1 %v2160_v2, %s2114_s20 }
  0x25   : > { %773 = vrot.lane.b32.xlu0 %v2158_v1, %s2115_s21  ;;  %775 = vrot.lane.b32.xlu1 %v2162_v3, %s2115_s21 }
  0x29   : > { %771 = vrot.lane.b32.xlu0 %v2160_v2, %s2115_s21  ;;  %477 = vrot.lane.b32.xlu1 %v2036_v4, %s2113_s19 }
  0x2d   : > { %627 = vrot.lane.b32.xlu0 %v2036_v4, %s2114_s20  ;;  %923 = vrot.lane.b32.xlu1 %v2158_v1, %s2116_s22  ;;  %s2011_s20 = smul.u32 48, %s2423_s13 }
  0x31   : > { %925 = vrot.lane.b32.xlu0 %v2162_v3, %s2116_s22  ;;  %921 = vrot.lane.b32.xlu1 %v2160_v2, %s2116_s22 }
  0x35   : > { %777 = vrot.lane.b32.xlu0 %v2036_v4, %s2115_s21  ;;  %1073 = vrot.lane.b32.xlu1 %v2158_v1, %s2117_s23 }
  0x39   : > { %1075 = vrot.lane.b32.xlu0 %v2162_v3, %s2117_s23  ;;  %1071 = vrot.lane.b32.xlu1 %v2160_v2, %s2117_s23 }
  0x3d   : > { %927 = vrot.lane.b32.xlu0 %v2036_v4, %s2116_s22  ;;  %1223 = vrot.lane.b32.xlu1 %v2158_v1, %s2118_s24 }
  0x41   : > { %1225 = vrot.lane.b32.xlu0 %v2162_v3, %s2118_s24  ;;  %1221 = vrot.lane.b32.xlu1 %v2160_v2, %s2118_s24 }
  0x45   : > { %1077 = vrot.lane.b32.xlu0 %v2036_v4, %s2117_s23  ;;  %1227 = vrot.lane.b32.xlu1 %v2036_v4, %s2118_s24  ;;  %s2395_s23 = scalar_lea.vmem %s2421_s3, %s2011_s20 }
  0x49   : > { %1373 = vrot.lane.b32.xlu0 %v2158_v1, %s2119_s25  ;;  %1375 = vrot.lane.b32.xlu1 %v2162_v3, %s2119_s25 }
  0x4d   : > { %1371 = vrot.lane.b32.xlu0 %v2160_v2, %s2119_s25  ;;  %1377 = vrot.lane.b32.xlu1 %v2036_v4, %s2119_s25  ;;  %v2049_v4 = vld [vmem:[%s2419_s1 + $0x60] sm:$0xff]  }
  0x51   : > { %1512 = vperm.xlu0 %2029, %v1506_v12   ;;  %1517 = vperm.xlu1 %2030, %v1507_v13  }
  0x55   : > { %1522 = vperm.xlu1 %2030, %v1508_v18   ;;  %1527 = vperm.xlu0 %2029, %v1509_v19   ;;  %v2053_v18 = vld [vmem:[%s2419_s1 + $0x80] sm:$0xff]   ;;  %v2054_v19 = vld [vmem:[%s2419_s1 + $0x88] sm:$0xff]  }
  0x83   : > { %v214_v5 = vpop.permute.xlu0 %213  ;;  %v212_v6 = vpop.permute.xlu1 %211 }
  0x84   : > { %v220_v10 = vsel %vm219_vm0, %v212_v6, %v214_v5 }
  0x87   : > { %v216_v7 = vpop.permute.xlu0 %215  ;;  %v218_v8 = vpop.permute.xlu1 %217 }
  0x88   : > { %v221_v9 = vsel %vm219_vm0, %v214_v5, %v216_v7  ;;  %v222_v14 = vsel %vm219_vm0, %v216_v7, %v218_v8 }
  0x89   : > { %233 = vmatprep.subr.bf16.mxu1 %v221_v9 }
  0x8a   : > { %234 = vmatpush1.bf16.msra.mxu1 %v220_v10  ;;  %v2050_v10 = vld [vmem:[%s2419_s1 + $0x68] sm:$0xff]  }
  0x8b   : > { %v474_v15 = vpop.permute.xlu0 %473  ;;  %1861 = vmatprep.subr.bf16.mxu1 %v222_v14  ;;  %v476_v16 = vpop.permute.xlu1 %475 }
  0x8c   : > { %v481_v17 = vsel %vm479_vm1, %v474_v15, %v476_v16 }
  0x8d   : > { %1735 = vmatmul.mubr.msk.bf16.vlgmr.msra.gmra.mrb[0].mxu1 %vm226_vm2, %v2037_v11  ;;  %492 = vmatprep.subr.bf16.mxu0 %v481_v17 }
  0x8e   : > { %1862 = vmatpush3.bf16.msra.mxu1 %v222_v14  ;;  %275 = vmatprep.mubr.bf16.mxu1 %v2111_v0 }
  0x8f   : > { %v472_v20 = vpop.permute.xlu0 %471  ;;  %v624_v21 = vpop.permute.xlu1 %623  ;;  %354 = vmatprep.subr.bf16.mxu1 %v2158_v1 }
  0x90   : > { %v480_v22 = vsel %vm479_vm1, %v472_v20, %v474_v15  ;;  %v2052_v15 = vld [vmem:[%s2419_s1 + $0x78] sm:$0xff]  }
  0x91   : > { %493 = vmatpush1.bf16.msra.mxu0 %v480_v22 }
  0x93   : > { %v626_v25 = vpop.permute.xlu0 %625  ;;  %v622_v26 = vpop.permute.xlu1 %621 }
  0x94   : > { %v630_v27 = vsel %vm629_vm3, %v622_v26, %v624_v21  ;;  %1751 = vmatmul.mubr.msk.bf16.vlgmr.msra.gmra.mrb[0].mxu0 %vm226_vm2, %v2211_v23  ;;  %v631_v28 = vsel %vm629_vm3, %v624_v21, %v626_v25 }
  0x95   : > { %1736 = vmatmul.mubr.msk.bf16.gmra.mrb[4].mxu1 %vm226_vm2, %v2039_v24  ;;  %534 = vmatprep.mubr.bf16.mxu0 %v2111_v0 }
  0x96   : > { %642 = vmatprep.subr.bf16.mxu0 %v631_v28  ;;  %1863 = vmatprep.mubr.msk.bf16.mxu1 %vm226_vm2, %v2037_v11  ;;  %v2051_v11 = vld [vmem:[%s2419_s1 + $0x70] sm:$0xff]  }
  0x97   : > { %v774_v29 = vpop.permute.xlu0 %773  ;;  %v2223_v30 = vpop.permute.xlu1 %775  ;;  %643 = vmatpush1.bf16.msra.mxu0 %v630_v27 }
  0x98   : > { %v781_v32 = vsel %vm779_vm4, %v774_v29, %v2223_v30 }
  0x99   : > { %792 = vmatprep.subr.bf16.mxu0 %v781_v32 }
  0x9b   : > { %v772_v33 = vpop.permute.xlu0 %771  ;;  %v478_v34 = vpop.permute.xlu1 %477 }
  0x9c   : > { %1752 = vmatmul.mubr.msk.bf16.gmra.mrb[4].mxu0 %vm226_vm2, %v2040_v31  ;;  %v780_v38 = vsel %vm779_vm4, %v772_v33, %v774_v29  ;;  %v482_v42 = vsel %vm479_vm1, %v476_v16, %v478_v34 }
  0x9d   : > { %1864 = vmatmul.mubr.msk.bf16.vlgmr.msra.gmra.mrb[8].mxu1 %vm226_vm2, %v2039_v24  ;;  %674 = vmatprep.mubr.bf16.mxu0 %v2111_v0 }
  0x9e   : > { %355 = vmatpush1.bf16.msra.mxu1 %v2160_v2  ;;  %386 = vmatprep.mubr.bf16.mxu1 %v2111_v0 }
  0x9f   : > { %1867 = vmatprep.subr.bf16.mxu1 %v2162_v3  ;;  %v628_v35 = vpop.permute.xlu0 %627  ;;  %v924_v40 = vpop.permute.xlu1 %923 }
  0xa0   : > { %v632_v52 = vsel %vm629_vm3, %v626_v25, %v628_v35 }
  0xa3   : > { %v2244_v39 = vpop.permute.xlu0 %925  ;;  %v922_v47 = vpop.permute.xlu1 %921 }
  0xa4   : > { %1761 = vmatmul.mubr.msk.bf16.vlgmr.msra.gmra.mrb[0].mxu0 %vm226_vm2, %v2041_v36  ;;  %v931_v41 = vsel %vm929_vm5, %v924_v40, %v2244_v39  ;;  %v930_v48 = vsel %vm929_vm5, %v922_v47, %v924_v40 }
  0xa5   : > { %1741 = vmatmul.mubr.msk.bf16.vlgmr.msra.gmra.mrb[0].mxu1 %vm226_vm2, %v2042_v37  ;;  %684 = vmatprep.mubr.bf16.mxu0 %v2111_v0 }
  0xa6   : > { %1868 = vmatpush3.bf16.msra.mxu1 %v2162_v3  ;;  %396 = vmatprep.mubr.bf16.mxu1 %v2111_v0 }
  0xa7   : > { %1873 = vmatprep.subr.bf16.mxu1 %v482_v42  ;;  %793 = vmatpush1.bf16.msra.mxu0 %v780_v38  ;;  %v778_v45 = vpop.permute.xlu0 %777  ;;  %v1074_v50 = vpop.permute.xlu1 %1073 }
  0xa8   : > { %942 = vmatprep.subr.bf16.mxu0 %v931_v41  ;;  %v782_v57 = vsel %vm779_vm4, %v2223_v30, %v778_v45 }
  0xab   : > { %v1076_v49 = vpop.permute.xlu0 %1075  ;;  %v1072_v55 = vpop.permute.xlu1 %1071 }
  0xac   : > { %1762 = vmatmul.mubr.msk.bf16.gmra.mrb[4].mxu0 %vm226_vm2, %v2043_v43  ;;  %v1081_v51 = vsel %vm1079_vm6, %v1074_v50, %v1076_v49  ;;  %v1080_v59 = vsel %vm1079_vm6, %v1072_v55, %v1074_v50 }
  0xad   : > { %1742 = vmatmul.mubr.msk.bf16.gmra.mrb[4].mxu1 %vm226_vm2, %v2044_v44  ;;  %824 = vmatprep.mubr.bf16.mxu0 %v2111_v0 }
  0xae   : > { %1869 = vmatprep.mubr.msk.bf16.mxu1 %vm226_vm2, %v2042_v37 }
  0xaf   : > { %v928_v54 = vpop.permute.xlu0 %927  ;;  %v1224_v60 = vpop.permute.xlu1 %1223 }
  0xb0   : > { %v932_v3 = vsel %vm929_vm5, %v2244_v39, %v928_v54 }
  0xb3   : > { %v1226_v58 = vpop.permute.xlu0 %1225  ;;  %v1222_v63 = vpop.permute.xlu1 %1221 }
  0xb4   : > { %1771 = vmatmul.mubr.msk.bf16.vlgmr.msra.gmra.mrb[0].mxu0 %vm226_vm2, %v2045_v46  ;;  %v1231_v61 = vsel %vm1229_vm7, %v1224_v60, %v1226_v58  ;;  %v1230_v6 = vsel %vm1229_vm7, %v1222_v63, %v1224_v60 }
  0xb5   : > { %1870 = vmatmul.mubr.msk.bf16.vlgmr.msra.gmra.mrb[8].mxu1 %vm226_vm2, %v2044_v44  ;;  %834 = vmatprep.mubr.bf16.mxu0 %v2111_v0 }
  0xb6   : > { %1874 = vmatpush3.bf16.msra.mxu1 %v482_v42  ;;  %943 = vmatpush1.bf16.msra.mxu0 %v930_v48 }
  0xb7   : > { %1879 = vmatprep.subr.bf16.mxu1 %v632_v52  ;;  %1875 = vmatprep.mubr.msk.bf16.mxu1 %vm226_vm2, %v2211_v23  ;;  %v1228_v1 = vpop.permute.xlu1 %1227  ;;  %v1078_v2 = vpop.permute.xlu0 %1077 }
  0xb8   : > { %1092 = vmatprep.subr.bf16.mxu0 %v1081_v51  ;;  %v1082_v9 = vsel %vm1079_vm6, %v1076_v49, %v1078_v2  ;;  %v1232_v14 = vsel %vm1229_vm7, %v1226_v58, %v1228_v1 }
  0xbb   : > { %v1376_v5 = vpop.permute.xlu1 %1375  ;;  %v1374_v7 = vpop.permute.xlu0 %1373 }
  0xbc   : > { %1772 = vmatmul.mubr.msk.bf16.gmra.mrb[4].mxu0 %vm226_vm2, %v2046_v53  ;;  %v1381_v8 = vsel %vm1379_vm8, %v1374_v7, %v1376_v5 }
  0xbd   : > { %974 = vmatprep.mubr.bf16.mxu0 %v2111_v0 }
  0xbf   : > { %v1372_v12 = vpop.permute.xlu0 %1371  ;;  %v1378_v16 = vpop.permute.xlu1 %1377 }
  0xc0   : > { %v1380_v13 = vsel %vm1379_vm8, %v1372_v12, %v1374_v7  ;;  %v1382_v17 = vsel %vm1379_vm8, %v1376_v5, %v1378_v16 }
  0xc1   : > { %1876 = vmatmul.mubr.msk.bf16.vlgmr.msra.gmra.mrb[8].mxu1 %vm226_vm2, %v2040_v31 }
  0xc2   : > { %1880 = vmatpush3.bf16.msra.mxu1 %v632_v52  ;;  %1881 = vmatprep.mubr.msk.bf16.mxu1 %vm226_vm2, %v2041_v36 }
  0xc3   : > { %1885 = vmatprep.subr.bf16.mxu1 %v782_v57 }
  0xc4   : > { %1781 = vmatmul.mubr.msk.bf16.vlgmr.msra.gmra.mrb[0].mxu0 %vm226_vm2, %v2047_v56 }
  0xc5   : > { %984 = vmatprep.mubr.bf16.mxu0 %v2111_v0  ;;  %1093 = vmatpush1.bf16.msra.mxu0 %v1080_v59 }
  0xc6   : > { %1242 = vmatprep.subr.bf16.mxu0 %v1231_v61 }
  0xcc   : > { %1782 = vmatmul.mubr.msk.bf16.gmra.mrb[4].mxu0 %vm226_vm2, %v2048_v62 }
  0xcd   : > { %1882 = vmatmul.mubr.msk.bf16.vlgmr.msra.gmra.mrb[8].mxu1 %vm226_vm2, %v2043_v43  ;;  %1124 = vmatprep.mubr.bf16.mxu0 %v2111_v0 }
  0xce   : > { %1886 = vmatpush3.bf16.msra.mxu1 %v782_v57  ;;  %1887 = vmatprep.mubr.msk.bf16.mxu1 %vm226_vm2, %v2045_v46 }
  0xcf   : > { %1891 = vmatprep.subr.bf16.mxu1 %v932_v3 }
  0xd0   : > { %v2343_v28 = vpop.permute.xlu0 %1512  ;;  %v2345_v33 = vpop.permute.xlu1 %1517 }
  0xd4   : > { %1791 = vmatmul.mubr.msk.bf16.vlgmr.msra.gmra.mrb[0].mxu0 %vm226_vm2, %v2049_v4  ;;  %v1523_v48 = vpop.permute.xlu1 %1522  ;;  %v1528_v55 = vpop.permute.xlu0 %1527 }
  0xd5   : > { %1134 = vmatprep.mubr.bf16.mxu0 %v2111_v0  ;;  %1243 = vmatpush1.bf16.msra.mxu0 %v1230_v6 }
  0xd6   : > { %1392 = vmatprep.subr.bf16.mxu0 %v1381_v8 }
  0xd9   : > { %1888 = vmatmul.mubr.msk.bf16.vlgmr.msra.gmra.mrb[8].mxu1 %vm226_vm2, %v2046_v53 }
  0xda   : > { %1892 = vmatpush3.bf16.msra.mxu1 %v932_v3  ;;  %1893 = vmatprep.mubr.msk.bf16.mxu1 %vm226_vm2, %v2047_v56 }
  0xdb   : > { %1897 = vmatprep.subr.bf16.mxu1 %v1082_v9 }
  0xdc   : > { %1792 = vmatmul.mubr.msk.bf16.gmra.mrb[4].mxu0 %vm226_vm2, %v2050_v10 }
  0xdd   : > { %1274 = vmatprep.mubr.bf16.mxu0 %v2111_v0 }
  0xe4   : > { %1801 = vmatmul.mubr.msk.bf16.vlgmr.msra.gmra.mrb[0].mxu0 %vm226_vm2, %v2051_v11 }
  0xe5   : > { %1894 = vmatmul.mubr.msk.bf16.vlgmr.msra.gmra.mrb[8].mxu1 %vm226_vm2, %v2048_v62  ;;  %1284 = vmatprep.mubr.bf16.mxu0 %v2111_v0 }
  0xe6   : > { %1898 = vmatpush3.bf16.msra.mxu1 %v1082_v9  ;;  %1393 = vmatpush1.bf16.msra.mxu0 %v1380_v13 }
  0xe7   : > { %1903 = vmatprep.subr.bf16.mxu1 %v1232_v14  ;;  %1899 = vmatprep.mubr.msk.bf16.mxu1 %vm226_vm2, %v2049_v4 }
  0xec   : > { %1802 = vmatmul.mubr.msk.bf16.gmra.mrb[4].mxu0 %vm226_vm2, %v2052_v15 }
  0xed   : > { %1424 = vmatprep.mubr.bf16.mxu0 %v2111_v0 }
  0xf1   : > { %1900 = vmatmul.mubr.msk.bf16.vlgmr.msra.gmra.mrb[8].mxu1 %vm226_vm2, %v2050_v10 }
  0xf2   : > { %1904 = vmatpush3.bf16.msra.mxu1 %v1232_v14  ;;  %1905 = vmatprep.mubr.msk.bf16.mxu1 %vm226_vm2, %v2051_v11 }
  0xf3   : > { %1909 = vmatprep.subr.bf16.mxu1 %v1382_v17 }
  0xf4   : > { %1811 = vmatmul.mubr.msk.bf16.vlgmr.msra.gmra.mrb[0].mxu0 %vm226_vm2, %v2053_v18 }
  0xf5   : > { %1434 = vmatprep.mubr.bf16.mxu0 %v2111_v0 }
  0xfc   : > { %1812 = vmatmul.mubr.msk.bf16.gmra.mrb[4].mxu0 %vm226_vm2, %v2054_v19 }
  0xfd   : > { %1906 = vmatmul.mubr.msk.bf16.vlgmr.msra.gmra.mrb[8].mxu1 %vm226_vm2, %v2052_v15 }
  0xfe   : > { %1910 = vmatpush3.bf16.msra.mxu1 %v1382_v17  ;;  %1911 = vmatprep.mubr.msk.bf16.mxu1 %vm226_vm2, %v2053_v18 }
 0x109   : > { %1912 = vmatmul.mubr.msk.bf16.vlgmr.msra.gmra.mrb[8].mxu1 %vm226_vm2, %v2054_v19 }
 0x178   : > { %v388_v20 = vpop.f32.mrb[0].mxu1 }
 0x179   : > { %v390_v21 = vpop.f32.mrb[1].mxu1 }
 0x17a   : > { %v392_v22 = vpop.f32.mrb[2].mxu1 }
 0x17b   : > { %v394_v23 = vpop.f32.mrb[3].mxu1 }
 0x180   : > { %v398_v24 = vpop.f32.mrb[4].mxu1 }
 0x181   : > { %v400_v25 = vpop.f32.mrb[5].mxu1 }
 0x182   : > { %v402_v0 = vpop.f32.mrb[6].mxu1 }
 0x183   : > { %v404_v26 = vpop.f32.mrb[7].mxu1 }
 0x1c7   : > { %v1426_v27 = vpop.f32.mrb[0].mxu0 }
 0x1c8   : > { %v1915_v29 = vadd.f32 %v1426_v27, %v388_v20  ;;  %v1428_v30 = vpop.f32.mrb[1].mxu0 }
 0x1c9   : > { %v1916_v31 = vadd.f32 %v1428_v30, %v390_v21  ;;  %v1430_v32 = vpop.f32.mrb[2].mxu0 }
 0x1ca   : > { %v2348_v34 = vadd.f32 %v1915_v29, %v2343_v28  ;;  %v1917_v35 = vadd.f32 %v1430_v32, %v392_v22  ;;  %v1432_v36 = vpop.f32.mrb[3].mxu0 }
 0x1cb   : > { %v2351_v37 = vadd.f32 %v1916_v31, %v2343_v28  ;;  %v1918_v38 = vadd.f32 %v1432_v36, %v394_v23 }
 0x1cc   : > { %v1542_v39 = vsub.f32 0.0, %v2348_v34  ;;  %v2355_v40 = vadd.f32 %v1917_v35, %v2345_v33 }
 0x1cd   : > { %v1543_v41 = vsub.f32 0.0, %v2351_v37  ;;  %v2359_v42 = vadd.f32 %v1918_v38, %v2345_v33 }
 0x1ce   : > { %v1554_v43 = vmul.f32 1.442695, %v1542_v39  ;;  %v1545_v44 = vsub.f32 0.0, %v2355_v40 }
 0x1cf   : > { %v1556_v45 = vmul.f32 1.442695, %v1543_v41  ;;  %v1546_v46 = vsub.f32 0.0, %v2359_v42  ;;  %v1436_v47 = vpop.f32.mrb[4].mxu0 }
 0x1d0   : > { %2055 = vpow2.f32 %v1554_v43  ;;  %v1560_v49 = vmul.f32 1.442695, %v1545_v44  ;;  %v1919_v50 = vadd.f32 %v1436_v47, %v398_v24  ;;  %v1438_v51 = vpop.f32.mrb[5].mxu0 }
 0x1d1   : > { %2057 = vpow2.f32 %v1556_v45  ;;  %v1562_v52 = vmul.f32 1.442695, %v1546_v46  ;;  %v1920_v53 = vadd.f32 %v1438_v51, %v400_v25  ;;  %v1440_v54 = vpop.f32.mrb[6].mxu0 }
 0x1d2   : > { %2059 = vpow2.f32 %v1560_v49  ;;  %v1921_v56 = vadd.f32 %v1440_v54, %v402_v0  ;;  %v2363_v57 = vadd.f32 %v1919_v50, %v1523_v48  ;;  %v1442_v58 = vpop.f32.mrb[7].mxu0 }
 0x1d3   : > { %2061 = vpow2.f32 %v1562_v52  ;;  %v2365_v59 = vadd.f32 %v1920_v53, %v1523_v48  ;;  %v1922_v60 = vadd.f32 %v1442_v58, %v404_v26 }
 0x1d4   : > { %v1548_v61 = vsub.f32 0.0, %v2363_v57  ;;  %v2368_v62 = vadd.f32 %v1921_v56, %v1528_v55 }
 0x1d5   : > { %v1549_v63 = vsub.f32 0.0, %v2365_v59  ;;  %v2371_v1 = vadd.f32 %v1922_v60, %v1528_v55 }
 0x1d6   : > { %v1566_v2 = vmul.f32 1.442695, %v1548_v61  ;;  %v1551_v3 = vsub.f32 0.0, %v2368_v62 }
 0x1d7   : > { %v1568_v4 = vmul.f32 1.442695, %v1549_v63  ;;  %v1552_v5 = vsub.f32 0.0, %v2371_v1 }
 0x1d8   : > { %2063 = vpow2.f32 %v1566_v2  ;;  %v1572_v6 = vmul.f32 1.442695, %v1551_v3 }
 0x1d9   : > { %2065 = vpow2.f32 %v1568_v4  ;;  %v1574_v7 = vmul.f32 1.442695, %v1552_v5 }
 0x1da   : > { %v2056_v8 = vpop.eup %2055  ;;  %2067 = vpow2.f32 %v1572_v6 }
 0x1db   : > { %v2058_v9 = vpop.eup %2057  ;;  %v1578_v10 = vadd.f32 1.0, %v2056_v8  ;;  %2069 = vpow2.f32 %v1574_v7 }
 0x1dc   : > { %v2060_v11 = vpop.eup %2059  ;;  %v1579_v12 = vadd.f32 1.0, %v2058_v9  ;;  %v1913_v13 = vpop.f32.mrb[8].mxu1 }
 0x1dd   : > { %v2062_v14 = vpop.eup %2061  ;;  %2071 = vrcp.f32 %v1578_v10  ;;  %v1581_v15 = vadd.f32 1.0, %v2060_v11  ;;  %v2375_v16 = vadd.f32 %v1913_v13, %v1523_v48  ;;  %v1479_v17 = vpop.f32.mrb[9].mxu1 }
 0x1de   : > { %2073 = vrcp.f32 %v1579_v12  ;;  %v1582_v18 = vadd.f32 1.0, %v2062_v14  ;;  %v2378_v19 = vadd.f32 %v2343_v28, %v1479_v17  ;;  %v1914_v20 = vpop.f32.mrb[10].mxu1 }
 0x1df   : > { %2075 = vrcp.f32 %v1581_v15  ;;  %v1550_v21 = vsub.f32 0.0, %v2375_v16  ;;  %v2381_v22 = vadd.f32 %v1914_v20, %v1528_v55  ;;  %v1482_v23 = vpop.f32.mrb[11].mxu1 }
 0x1e0   : > { %2077 = vrcp.f32 %v1582_v18  ;;  %v1544_v24 = vsub.f32 0.0, %v2378_v19  ;;  %v2385_v25 = vadd.f32 %v2345_v33, %v1482_v23 }
 0x1e1   : > { %v1570_v0 = vmul.f32 1.442695, %v1550_v21  ;;  %v1553_v26 = vsub.f32 0.0, %v2381_v22 }
 0x1e2   : > { %v2064_v27 = vpop.eup %2063  ;;  %v1558_v28 = vmul.f32 1.442695, %v1544_v24  ;;  %v1547_v29 = vsub.f32 0.0, %v2385_v25 }
 0x1e3   : > { %v2066_v30 = vpop.eup %2065  ;;  %v1584_v31 = vadd.f32 1.0, %v2064_v27  ;;  %2079 = vpow2.f32 %v1570_v0  ;;  %v1576_v39 = vmul.f32 1.442695, %v1553_v26 }
 0x1e4   : > { %v2068_v32 = vpop.eup %2067  ;;  %v1585_v35 = vadd.f32 1.0, %v2066_v30  ;;  %2081 = vpow2.f32 %v1558_v28  ;;  %v1564_v41 = vmul.f32 1.442695, %v1547_v29 }
 0x1e5   : > { %v2070_v36 = vpop.eup %2069  ;;  %2083 = vrcp.f32 %v1584_v31  ;;  %v1587_v38 = vadd.f32 1.0, %v2068_v32 }
 0x1e6   : > { %2085 = vrcp.f32 %v1585_v35  ;;  %v1588_v33 = vadd.f32 1.0, %v2070_v36 }
 0x1e7   : > { %v2072_v43 = vpop.eup %2071  ;;  %2087 = vrcp.f32 %v1587_v38 }
 0x1e8   : > { %v2074_v44 = vpop.eup %2073  ;;  %v1602_v45 = vmul.f32 %v2072_v43, %v2348_v34  ;;  %2089 = vrcp.f32 %v1588_v33 }
 0x1e9   : > { %v2076_v46 = vpop.eup %2075  ;;  %v1603_v47 = vmul.f32 %v2074_v44, %v2351_v37  ;;  %2091 = vpow2.f32 %v1576_v39 }
 0x1ea   : > { %v2078_v48 = vpop.eup %2077  ;;  %v1605_v49 = vmul.f32 %v2076_v46, %v2355_v40  ;;  %2093 = vpow2.f32 %v1564_v41 }
 0x1eb   : > { %v1826_v50 = vpack.c.bf16 %v1603_v47, %v1602_v45  ;;  %v1606_v51 = vmul.f32 %v2078_v48, %v2359_v42 }
 0x1ed   : > { %v2080_v34 = vpop.eup %2079  ;;  %1654 = vst [vmem:[%s2395_s23] sm:$0xff] %v1826_v50  ;;  %v1828_v52 = vpack.c.bf16 %v1606_v51, %v1605_v49 }
 0x1ee   : > { %v2082_v53 = vpop.eup %2081  ;;  %v1586_v37 = vadd.f32 1.0, %v2080_v34 }
 0x1ef   : > { %v2084_v54 = vpop.eup %2083  ;;  %1656 = vst [vmem:[%s2395_s23 + $0xc] sm:$0xff] %v1828_v52  ;;  %v1580_v55 = vadd.f32 1.0, %v2082_v53 }
 0x1f0   : > { %v2086_v56 = vpop.eup %2085  ;;  %v1608_v58 = vmul.f32 %v2084_v54, %v2363_v57  ;;  %2095 = vrcp.f32 %v1586_v37 }
 0x1f1   : > { %v2088_v60 = vpop.eup %2087  ;;  %v1609_v40 = vmul.f32 %v2086_v56, %v2365_v59  ;;  %2097 = vrcp.f32 %v1580_v55 }
 0x1f2   : > { %v2090_v61 = vpop.eup %2089  ;;  %v1611_v42 = vmul.f32 %v2088_v60, %v2368_v62 }
 0x1f3   : > { %v2092_v63 = vpop.eup %2091  ;;  %v1830_v2 = vpack.c.bf16 %v1609_v40, %v1608_v58  ;;  %v1612_v3 = vmul.f32 %v2090_v61, %v2371_v1 }
 0x1f4   : > { %v2094_v4 = vpop.eup %2093  ;;  %v1589_v5 = vadd.f32 1.0, %v2092_v63 }
 0x1f5   : > { %1658 = vst [vmem:[%s2395_s23 + $0x18] sm:$0xff] %v1830_v2  ;;  %v1832_v6 = vpack.c.bf16 %v1612_v3, %v1611_v42  ;;  %v1583_v57 = vadd.f32 1.0, %v2094_v4 }
 0x1f6   : > { %2099 = vrcp.f32 %v1589_v5 }
 0x1f7   : > { %1660 = vst [vmem:[%s2395_s23 + $0x24] sm:$0xff] %v1832_v6  ;;  %2101 = vrcp.f32 %v1583_v57 }
 0x1fa   : > { %v2096_v59 = vpop.eup %2095 }
 0x1fb   : > { %v2098_v7 = vpop.eup %2097  ;;  %v1610_v62 = vmul.f32 %v2096_v59, %v2375_v16 }
 0x1fc   : > { %v1604_v8 = vmul.f32 %v2098_v7, %v2378_v19 }
 0x1fd   : > { %v1831_v9 = vpack.c.bf16 %v1610_v62, %v1610_v62 }
 0x1fe   : > { %v1827_v10 = vpack.c.bf16 %v1604_v8, %v1604_v8 }
 0x1ff   : > { %1659 = vst [vmem:[%s2395_s23 + $0x20] sm:$0xf] %v1831_v9 }
 0x200   : > { %v2100_v1 = vpop.eup %2099  ;;  %1655 = vst [vmem:[%s2395_s23 + $0x8] sm:$0xf] %v1827_v10 }
 0x201   : > { %v2102_v11 = vpop.eup %2101  ;;  %v1613_v12 = vmul.f32 %v2100_v1, %v2381_v22 }
 0x202   : > { %v1607_v13 = vmul.f32 %v2102_v11, %v2385_v25 }
 0x203   : > { %v1833_v14 = vpack.c.bf16 %v1613_v12, %v1613_v12 }
 0x204   : > { %v1829_v15 = vpack.c.bf16 %v1607_v13, %v1607_v13 }
 0x205   : > { %1661 = vst [vmem:[%s2395_s23 + $0x2c] sm:$0xf] %v1833_v14 }
 0x206   : > { %1657 = vst [vmem:[%s2395_s23 + $0x14] sm:$0xf] %v1829_v15 }
 0x207 PF: > { %s13_s12 = sadd.s32 1, %s2109_s12  }
 0x208   : > { %p10_p4 = scmp.ge.s32.totalorder %s13_s12, 4  }
 0x20a   :  { %12 = sbr.rel (!%p10_p4) target bundleno = 1 (0x1), region = 70 }

</bundles_post_ra>
